<compile_context>
chip_gen: v7x
topology: tpu7x:2x2x1
jax: 0.10.0
libtpu: 0.0.40
codegen_flags: <defaults>
</compile_context>

<pallas_src>
import functools

import jax
import jax.numpy as jnp
from jax.experimental import pallas as pl
from jax.experimental.pallas import tpu as pltpu

LANE = 128                 # lane alignment for padded feature dims
SUBLANE = 8                # sublane alignment for batch tiles
VMEM_HEADROOM = 12 << 20   # headroom for compiler scratch etc.


def _round_up(x, m):
    return ((x + m - 1) // m) * m


def _usable_vmem_bytes():
    """Per-TensorCore VMEM we allow ourselves (generation-aware, with headroom)."""
    cap = 64 << 20  # conservative default = v7x per-TC VMEM
    try:
        info = pltpu.get_tpu_info()
        cap = int(getattr(info, "vmem_capacity_bytes", cap) or cap)
    except Exception:
        pass
    return max(cap - VMEM_HEADROOM, 16 << 20)


def _mlp_kernel(n_layers, x_ref, *refs):
    """Fused MLP forward over one batch tile.

    refs layout: (w0, b0), ..., (w_{L-1}, b_{L-1}), out_ref, tsne_ref
    x_ref: (tile_b, in_features) f32/bf16, cast to bf16 here (MXU operand).
    Weights are bf16 (k_pad, n_pad); biases are f32 (1, n_pad).
    Matmuls run bf16 x bf16 -> f32 accumulate on the MXU; bias + ReLU in f32 (VPU).
    """
    param_refs = refs[:2 * n_layers]
    out_ref, tsne_ref = refs[2 * n_layers], refs[2 * n_layers + 1]

    h_bf16 = x_ref[...].astype(jnp.bfloat16)

    if n_layers == 1:
        # tsne is the (dropout-identity) flattened input itself.
        tsne_ref[...] = x_ref[...].astype(tsne_ref.dtype)

    h_f32 = None
    # Hidden layers: (Dropout -> identity) -> Linear -> ReLU
    for i in range(n_layers - 1):
        w = param_refs[2 * i][...]            # bf16 (k_pad, n_pad)
        b = param_refs[2 * i + 1][...]        # f32  (1, n_pad)
        h_f32 = jnp.maximum(
            jnp.dot(h_bf16, w, preferred_element_type=jnp.float32) + b, 0.0)
        h_bf16 = h_f32.astype(jnp.bfloat16)

    if n_layers > 1:
        # tsne = activation entering the final linear layer.
        tsne_ref[...] = h_f32.astype(tsne_ref.dtype)

    # Final layer: Linear, no activation.
    w_last = param_refs[2 * (n_layers - 1)][...]
    b_last = param_refs[2 * (n_layers - 1) + 1][...]
    out_ref[...] = (jnp.dot(h_bf16, w_last, preferred_element_type=jnp.float32)
                    + b_last).astype(out_ref.dtype)


def prepare_params(weights, biases):
    """Pad + cast Linear params ONCE (call at model-load time, outside the forward).

    weights: list of (in, out) f32 arrays (transposed vs. PyTorch's (out, in)).
    biases:  list of (out,) f32 arrays.

    Layer 0 keeps its K (input-feature) dim unpadded so raw flattened activations can
    be fed straight to the kernel; every output/N dim (and subsequent K dims) is padded
    to a lane multiple so all stores are lane-dense. Zero padding is numerically exact.
    """
    n_layers = len(weights)
    dims = [int(weights[0].shape[0])] + [int(w.shape[1]) for w in weights]
    dims_pad = [dims[0]] + [_round_up(d, LANE) for d in dims[1:]]
    flat = []
    for i, (w, b) in enumerate(zip(weights, biases)):
        k_pad, n_pad = dims_pad[i], dims_pad[i + 1]
        w_p = jnp.zeros((k_pad, n_pad), jnp.bfloat16)
        w_p = w_p.at[:dims[i], :dims[i + 1]].set(w.astype(jnp.bfloat16))
        b_p = jnp.zeros((1, n_pad), jnp.float32)
        b_p = b_p.at[0, :dims[i + 1]].set(b.astype(jnp.float32))
        flat += [w_p, b_p]
    return dict(flat_params=tuple(flat), dims=tuple(dims), dims_pad=tuple(dims_pad),
                n_layers=n_layers)


def parametric_fc_forward(xin, prepared, *, tile_b=None, tsne_dtype=jnp.bfloat16):
    """Pallas wrapper for ParametricFCModel.forward (eval-mode semantics).

    xin:      (B, C, W) float32 or bfloat16
    prepared: output of prepare_params()
    Returns (x_out, x_hole, x_day, tsne) matching the PyTorch module (eval mode).
    """
    flat_params = prepared["flat_params"]
    dims, dims_pad = prepared["dims"], prepared["dims_pad"]
    n_layers = prepared["n_layers"]

    B = xin.shape[0]
    x = xin.reshape(B, -1)                         # th.flatten(xin, 1) -- no copy
    if x.dtype != jnp.bfloat16:
        x = x.astype(jnp.float32)                  # accept f32 or bf16 activations
    in_features = dims[0]
    assert x.shape[1] == in_features, (x.shape, in_features)

    n_classes, classes_pad = dims[-1], dims_pad[-1]
    tsne_dim, tsne_w = dims[-2], dims_pad[-2]      # width fed into the last layer

    weight_bytes = sum(int(p.size) * p.dtype.itemsize for p in flat_params)
    tsne_isize = jnp.dtype(tsne_dtype).itemsize
    usable_vmem = _usable_vmem_bytes()

    def vmem_need(tb, w_buf_factor):
        io = tb * (in_features * x.dtype.itemsize      # x tile
                   + classes_pad * 4                   # x_out tile (f32)
                   + tsne_w * tsne_isize)              # tsne tile
        act = 2 * tb * max(dims_pad) * 4               # f32 activation temporaries
        return weight_bytes * w_buf_factor + 2 * io + act + (2 << 20)

    # Batch tiling: big tiles amortize per-step overhead; >=2 tiles feeds both v7x TCs.
    if tile_b is None:
        max_tile = 1024 if usable_vmem >= (96 << 20) else 512   # v5e/v6e vs v7x
        if B <= SUBLANE:
            tile_b = B
        else:
            tile_b = min(max_tile, _round_up(pl.cdiv(B, 2), SUBLANE))
    else:
        tile_b = min(int(tile_b), B)
        if tile_b < B:
            tile_b = _round_up(tile_b, SUBLANE)
    # Shrink tile_b until the footprint fits this generation's VMEM.
    while tile_b > SUBLANE and vmem_need(tile_b, 1) > usable_vmem:
        tile_b = max(SUBLANE, _round_up(tile_b // 2, SUBLANE))
    if vmem_need(tile_b, 1) > usable_vmem:
        # TODO(synk): K-tiled ("arbitrary" reduction axis w/ accumulator scratch) or
        # per-layer fallback for weight sets exceeding one TC's VMEM (e.g. v7x 64 MiB).
        raise NotImplementedError(
            "padded weights do not fit VMEM; K-tiled fallback not implemented")
    num_tiles = pl.cdiv(B, tile_b)                 # partial last tile -> masked writes

    flops = 2 * B * sum(dims_pad[i] * dims_pad[i + 1] for i in range(n_layers))
    bytes_accessed = (B * in_features * x.dtype.itemsize + weight_bytes
                      + B * (classes_pad * 4 + tsne_w * tsne_isize))
    cost = pl.CostEstimate(flops=int(flops), transcendentals=0,
                           bytes_accessed=int(bytes_accessed))

    kernel = functools.partial(_mlp_kernel, n_layers)
    out_shape = (jax.ShapeDtypeStruct((B, classes_pad), jnp.float32),
                 jax.ShapeDtypeStruct((B, tsne_w), tsne_dtype))
    x_spec = pl.BlockSpec((tile_b, in_features), lambda g: (g, 0))
    out_specs = (pl.BlockSpec((tile_b, classes_pad), lambda g: (g, 0)),
                 pl.BlockSpec((tile_b, tsne_w), lambda g: (g, 0)))

    def _call(single_buffer_weights):
        pm = dict(pipeline_mode=pl.Buffered(1)) if single_buffer_weights else {}
        param_specs = []
        for i in range(n_layers):
            param_specs.append(
                pl.BlockSpec((dims_pad[i], dims_pad[i + 1]), lambda g: (0, 0), **pm))
            param_specs.append(
                pl.BlockSpec((1, dims_pad[i + 1]), lambda g: (0, 0), **pm))
        w_factor = 1 if single_buffer_weights else 2
        vmem_limit = int(min(usable_vmem, vmem_need(tile_b, w_factor) + (4 << 20)))
        return pl.pallas_call(
            kernel,
            out_shape=out_shape,
            grid=(num_tiles,),
            in_specs=[x_spec] + param_specs,
            out_specs=out_specs,
            compiler_params=pltpu.CompilerParams(
                dimension_semantics=("parallel",),   # batch axis -> both TCs on v7x
                vmem_limit_bytes=vmem_limit),
            cost_estimate=cost,
        )(x, *flat_params)

    try:
        out_p, tsne_p = _call(True)       # single-buffered resident weights
    except Exception:
        out_p, tsne_p = _call(False)      # fallback: default double-buffered weights

    # Strip lane padding only where it was actually added (batch is never padded).
    x_out = out_p if classes_pad == n_classes else out_p[:, :n_classes]
    tsne = tsne_p if tsne_w == tsne_dim else tsne_p[:, :tsne_dim]

    # TODO(synk): nn.Dropout is modeled as identity (eval-mode semantics); training-mode
    # stochastic dropout via pltpu.prng_seed/prng_random_bits is not wired up here.
    x_hole = 0
    x_day = 0
    return x_out, x_hole, x_day, tsne


def init_params(key, input_size, neurons, n_classes, n_fc_layers):
    """Deterministic Linear params. Layer sizes follow the PyTorch __init__:
    layer 0: input_size -> neurons; middle: neurons -> neurons; last: neurons -> n_classes.
    Total number of Linear layers = n_fc_layers + 1."""
    weights, biases = [], []
    dims = [input_size] + [neurons] * n_fc_layers + [n_classes]
    for i in range(len(dims) - 1):
        key, kw, kb = jax.random.split(key, 3)
        bound = 1.0 / jnp.sqrt(dims[i])
        # Stored as (in, out): transpose of PyTorch's (out, in) Linear weight.
        w = jax.random.uniform(kw, (dims[i], dims[i + 1]), jnp.float32, -bound, bound)
        b = jax.random.uniform(kb, (dims[i + 1],), jnp.float32, -bound, bound)
        weights.append(w)
        biases.append(b)
    return weights, biases


if __name__ == "__main__":
    # Small shapes consistent with the module: image (C, W) -> flattened input C*W;
    # n_fc_layers=3 => 4 Linear layers, neurons=32, 3 classes; dropout identity (eval).
    B, C, W = 2, 4, 16
    neurons = 32
    n_classes = 3
    n_fc_layers = 3

    key = jax.random.PRNGKey(0)
    key, kx = jax.random.split(key)
    xin = jax.random.normal(kx, (B, C, W), jnp.float32)

    weights, biases = init_params(key, C * W, neurons, n_classes, n_fc_layers)
    prepared = prepare_params(weights, biases)     # once, at "model load" time

    x_out, x_hole, x_day, tsne = parametric_fc_forward(xin, prepared)
    jax.block_until_ready(x_out)
    jax.block_until_ready(tsne)

    assert x_out.shape == (B, n_classes), x_out.shape
    assert tsne.shape == (B, neurons), tsne.shape

    # Reference mirroring the kernel numerics (bf16 MXU operands, f32 accumulation).
    h_bf = xin.reshape(B, -1).astype(jnp.bfloat16)
    h_f32 = xin.reshape(B, -1)
    for i in range(len(weights) - 1):
        h_f32 = jnp.maximum(
            jnp.dot(h_bf, weights[i].astype(jnp.bfloat16),
                    preferred_element_type=jnp.float32) + biases[i], 0.0)
        h_bf = h_f32.astype(jnp.bfloat16)
    out_mirror = jnp.dot(h_bf, weights[-1].astype(jnp.bfloat16),
                         preferred_element_type=jnp.float32) + biases[-1]
    assert jnp.allclose(x_out, out_mirror, atol=1e-3, rtol=1e-3), "x_out mismatch"
    assert jnp.allclose(tsne.astype(jnp.float32), h_f32, atol=5e-2, rtol=5e-2), \
        "tsne mismatch"

    # Loose sanity check against the pure-f32 PyTorch-equivalent math.
    h_full = xin.reshape(B, -1)
    for i in range(len(weights) - 1):
        h_full = jnp.maximum(h_full @ weights[i] + biases[i], 0.0)
    out_full = h_full @ weights[-1] + biases[-1]
    assert jnp.allclose(x_out, out_full, atol=5e-2, rtol=5e-2), "f32 sanity mismatch"

    assert x_hole == 0 and x_day == 0
    print("KERNEL_OK")
</pallas_src>

<mosaic_0001>
module attributes {stable_mosaic.version = 11 : i64} {
  func.func @_mlp_kernel(%arg0: i32, %arg1: memref<2x64xf32, #tpu.memory_space<vmem>>, %arg2: memref<64x128xbf16, #tpu.memory_space<vmem>>, %arg3: memref<1x128xf32, #tpu.memory_space<vmem>>, %arg4: memref<128x128xbf16, #tpu.memory_space<vmem>>, %arg5: memref<1x128xf32, #tpu.memory_space<vmem>>, %arg6: memref<128x128xbf16, #tpu.memory_space<vmem>>, %arg7: memref<1x128xf32, #tpu.memory_space<vmem>>, %arg8: memref<128x128xbf16, #tpu.memory_space<vmem>>, %arg9: memref<1x128xf32, #tpu.memory_space<vmem>>, %arg10: memref<2x128xf32, #tpu.memory_space<vmem>>, %arg11: memref<2x128xbf16, #tpu.memory_space<vmem>>) attributes {dimension_semantics = [#tpu.dimension_semantics<parallel>], iteration_bounds = array<i64: 1>, scalar_prefetch = 0 : i64, scratch_operands = 0 : i64, tpu.core_type = #tpu.core_type<tc>, window_params = [{transform_indices = @transform_0, window_bounds = array<i64: 2, 64>}, {pipeline_mode = #tpu.pipeline_mode<synchronous>, transform_indices = @transform_1, window_bounds = array<i64: 64, 128>}, {pipeline_mode = #tpu.pipeline_mode<synchronous>, transform_indices = @transform_2, window_bounds = array<i64: 1, 128>}, {pipeline_mode = #tpu.pipeline_mode<synchronous>, transform_indices = @transform_3, window_bounds = array<i64: 128, 128>}, {pipeline_mode = #tpu.pipeline_mode<synchronous>, transform_indices = @transform_4, window_bounds = array<i64: 1, 128>}, {pipeline_mode = #tpu.pipeline_mode<synchronous>, transform_indices = @transform_5, window_bounds = array<i64: 128, 128>}, {pipeline_mode = #tpu.pipeline_mode<synchronous>, transform_indices = @transform_6, window_bounds = array<i64: 1, 128>}, {pipeline_mode = #tpu.pipeline_mode<synchronous>, transform_indices = @transform_7, window_bounds = array<i64: 128, 128>}, {pipeline_mode = #tpu.pipeline_mode<synchronous>, transform_indices = @transform_8, window_bounds = array<i64: 1, 128>}, {transform_indices = @transform_9, window_bounds = array<i64: 2, 128>}, {transform_indices = @transform_10, window_bounds = array<i64: 2, 128>}]} {
    %c0 = arith.constant 0 : index
    %c0_0 = arith.constant 0 : index
    %0 = vector.load %arg1[%c0, %c0_0] : memref<2x64xf32, #tpu.memory_space<vmem>>, vector<2x64xf32>
    %1 = arith.truncf %0 : vector<2x64xf32> to vector<2x64xbf16>
    %c0_1 = arith.constant 0 : index
    %c0_2 = arith.constant 0 : index
    %2 = vector.load %arg2[%c0_1, %c0_2] : memref<64x128xbf16, #tpu.memory_space<vmem>>, vector<64x128xbf16>
    %c0_3 = arith.constant 0 : index
    %c0_4 = arith.constant 0 : index
    %3 = vector.load %arg3[%c0_3, %c0_4] : memref<1x128xf32, #tpu.memory_space<vmem>>, vector<1x128xf32>
    %cst = arith.constant dense<0.000000e+00> : vector<2x128xf32>
    %4 = tpu.matmul %1, %2, %cst {dimension_numbers = #tpu.dot_dimension_numbers<[1], [0], [0], [1], [0, 0, 1, 1], [], []>} : vector<2x64xbf16>, vector<64x128xbf16>, vector<2x128xf32> -> vector<2x128xf32>
    %5 = vector.broadcast %3 : vector<1x128xf32> to vector<2x128xf32>
    %6 = arith.addf %4, %5 : vector<2x128xf32>
    %cst_5 = arith.constant 0.000000e+00 : f32
    %7 = vector.broadcast %cst_5 : f32 to vector<2x128xf32>
    %8 = arith.maximumf %6, %7 : vector<2x128xf32>
    %9 = arith.truncf %8 : vector<2x128xf32> to vector<2x128xbf16>
    %c0_6 = arith.constant 0 : index
    %c0_7 = arith.constant 0 : index
    %10 = vector.load %arg4[%c0_6, %c0_7] : memref<128x128xbf16, #tpu.memory_space<vmem>>, vector<128x128xbf16>
    %c0_8 = arith.constant 0 : index
    %c0_9 = arith.constant 0 : index
    %11 = vector.load %arg5[%c0_8, %c0_9] : memref<1x128xf32, #tpu.memory_space<vmem>>, vector<1x128xf32>
    %cst_10 = arith.constant dense<0.000000e+00> : vector<2x128xf32>
    %12 = tpu.matmul %9, %10, %cst_10 {dimension_numbers = #tpu.dot_dimension_numbers<[1], [0], [0], [1], [0, 0, 1, 1], [], []>} : vector<2x128xbf16>, vector<128x128xbf16>, vector<2x128xf32> -> vector<2x128xf32>
    %13 = vector.broadcast %11 : vector<1x128xf32> to vector<2x128xf32>
    %14 = arith.addf %12, %13 : vector<2x128xf32>
    %cst_11 = arith.constant 0.000000e+00 : f32
    %15 = vector.broadcast %cst_11 : f32 to vector<2x128xf32>
    %16 = arith.maximumf %14, %15 : vector<2x128xf32>
    %17 = arith.truncf %16 : vector<2x128xf32> to vector<2x128xbf16>
    %c0_12 = arith.constant 0 : index
    %c0_13 = arith.constant 0 : index
    %18 = vector.load %arg6[%c0_12, %c0_13] : memref<128x128xbf16, #tpu.memory_space<vmem>>, vector<128x128xbf16>
    %c0_14 = arith.constant 0 : index
    %c0_15 = arith.constant 0 : index
    %19 = vector.load %arg7[%c0_14, %c0_15] : memref<1x128xf32, #tpu.memory_space<vmem>>, vector<1x128xf32>
    %cst_16 = arith.constant dense<0.000000e+00> : vector<2x128xf32>
    %20 = tpu.matmul %17, %18, %cst_16 {dimension_numbers = #tpu.dot_dimension_numbers<[1], [0], [0], [1], [0, 0, 1, 1], [], []>} : vector<2x128xbf16>, vector<128x128xbf16>, vector<2x128xf32> -> vector<2x128xf32>
    %21 = vector.broadcast %19 : vector<1x128xf32> to vector<2x128xf32>
    %22 = arith.addf %20, %21 : vector<2x128xf32>
    %cst_17 = arith.constant 0.000000e+00 : f32
    %23 = vector.broadcast %cst_17 : f32 to vector<2x128xf32>
    %24 = arith.maximumf %22, %23 : vector<2x128xf32>
    %25 = arith.truncf %24 : vector<2x128xf32> to vector<2x128xbf16>
    %26 = arith.truncf %24 : vector<2x128xf32> to vector<2x128xbf16>
    %c0_18 = arith.constant 0 : index
    %c0_19 = arith.constant 0 : index
    %27 = vector.load %arg11[%c0_18, %c0_19] : memref<2x128xbf16, #tpu.memory_space<vmem>>, vector<2x128xbf16>
    tpu.vector_store %arg11[%c0_18, %c0_19], %26 {strides = array<i32>} : memref<2x128xbf16, #tpu.memory_space<vmem>>, vector<2x128xbf16>,
    %c0_20 = arith.constant 0 : index
    %c0_21 = arith.constant 0 : index
    %28 = vector.load %arg8[%c0_20, %c0_21] : memref<128x128xbf16, #tpu.memory_space<vmem>>, vector<128x128xbf16>
    %c0_22 = arith.constant 0 : index
    %c0_23 = arith.constant 0 : index
    %29 = vector.load %arg9[%c0_22, %c0_23] : memref<1x128xf32, #tpu.memory_space<vmem>>, vector<1x128xf32>
    %cst_24 = arith.constant dense<0.000000e+00> : vector<2x128xf32>
    %30 = tpu.matmul %25, %28, %cst_24 {dimension_numbers = #tpu.dot_dimension_numbers<[1], [0], [0], [1], [0, 0, 1, 1], [], []>} : vector<2x128xbf16>, vector<128x128xbf16>, vector<2x128xf32> -> vector<2x128xf32>
    %31 = vector.broadcast %29 : vector<1x128xf32> to vector<2x128xf32>
    %32 = arith.addf %30, %31 : vector<2x128xf32>
    %c0_25 = arith.constant 0 : index
    %c0_26 = arith.constant 0 : index
    %33 = vector.load %arg10[%c0_25, %c0_26] : memref<2x128xf32, #tpu.memory_space<vmem>>, vector<2x128xf32>
    tpu.vector_store %arg10[%c0_25, %c0_26], %32 {strides = array<i32>} : memref<2x128xf32, #tpu.memory_space<vmem>>, vector<2x128xf32>,
    return
  }
  func.func @transform_0(%arg0: i32) -> (i32, i32) {
    %c0_i32 = arith.constant 0 : i32
    %c0_i32_0 = arith.constant 0 : i32
    return %arg0, %c0_i32 : i32, i32
  }
  func.func @transform_1(%arg0: i32) -> (i32, i32) {
    %c0_i32 = arith.constant 0 : i32
    %c0_i32_0 = arith.constant 0 : i32
    %c0_i32_1 = arith.constant 0 : i32
    return %c0_i32, %c0_i32_0 : i32, i32
  }
  func.func @transform_2(%arg0: i32) -> (i32, i32) {
    %c0_i32 = arith.constant 0 : i32
    %c0_i32_0 = arith.constant 0 : i32
    %c0_i32_1 = arith.constant 0 : i32
    return %c0_i32, %c0_i32_0 : i32, i32
  }
  func.func @transform_3(%arg0: i32) -> (i32, i32) {
    %c0_i32 = arith.constant 0 : i32
    %c0_i32_0 = arith.constant 0 : i32
    %c0_i32_1 = arith.constant 0 : i32
    return %c0_i32, %c0_i32_0 : i32, i32
  }
  func.func @transform_4(%arg0: i32) -> (i32, i32) {
    %c0_i32 = arith.constant 0 : i32
    %c0_i32_0 = arith.constant 0 : i32
    %c0_i32_1 = arith.constant 0 : i32
    return %c0_i32, %c0_i32_0 : i32, i32
  }
  func.func @transform_5(%arg0: i32) -> (i32, i32) {
    %c0_i32 = arith.constant 0 : i32
    %c0_i32_0 = arith.constant 0 : i32
    %c0_i32_1 = arith.constant 0 : i32
    return %c0_i32, %c0_i32_0 : i32, i32
  }
  func.func @transform_6(%arg0: i32) -> (i32, i32) {
    %c0_i32 = arith.constant 0 : i32
    %c0_i32_0 = arith.constant 0 : i32
    %c0_i32_1 = arith.constant 0 : i32
    return %c0_i32, %c0_i32_0 : i32, i32
  }
  func.func @transform_7(%arg0: i32) -> (i32, i32) {
    %c0_i32 = arith.constant 0 : i32
    %c0_i32_0 = arith.constant 0 : i32
    %c0_i32_1 = arith.constant 0 : i32
    return %c0_i32, %c0_i32_0 : i32, i32
  }
  func.func @transform_8(%arg0: i32) -> (i32, i32) {
    %c0_i32 = arith.constant 0 : i32
    %c0_i32_0 = arith.constant 0 : i32
    %c0_i32_1 = arith.constant 0 : i32
    return %c0_i32, %c0_i32_0 : i32, i32
  }
  func.func @transform_9(%arg0: i32) -> (i32, i32) {
    %c0_i32 = arith.constant 0 : i32
    %c0_i32_0 = arith.constant 0 : i32
    return %arg0, %c0_i32 : i32, i32
  }
  func.func @transform_10(%arg0: i32) -> (i32, i32) {
    %c0_i32 = arith.constant 0 : i32
    %c0_i32_0 = arith.constant 0 : i32
    return %arg0, %c0_i32 : i32, i32
  }
}

module attributes {stable_mosaic.version = 11 : i64} {
  func.func @_mlp_kernel(%arg0: i32, %arg1: memref<2x64xf32, #tpu.memory_space<vmem>>, %arg2: memref<64x128xbf16, #tpu.memory_space<vmem>>, %arg3: memref<1x128xf32, #tpu.memory_space<vmem>>, %arg4: memref<128x128xbf16, #tpu.memory_space<vmem>>, %arg5: memref<1x128xf32, #tpu.memory_space<vmem>>, %arg6: memref<128x128xbf16, #tpu.memory_space<vmem>>, %arg7: memref<1x128xf32, #tpu.memory_space<vmem>>, %arg8: memref<128x128xbf16, #tpu.memory_space<vmem>>, %arg9: memref<1x128xf32, #tpu.memory_space<vmem>>, %arg10: memref<2x128xf32, #tpu.memory_space<vmem>>, %arg11: memref<2x128xbf16, #tpu.memory_space<vmem>>) attributes {dimension_semantics = [#tpu.dimension_semantics<parallel>], iteration_bounds = array<i64: 1>, scalar_prefetch = 0 : i64, scratch_operands = 0 : i64, tpu.core_type = #tpu.core_type<tc>, window_params = [{transform_indices = @transform_0, window_bounds = array<i64: 2, 64>}, {pipeline_mode = #tpu.pipeline_mode<synchronous>, transform_indices = @transform_1, window_bounds = array<i64: 64, 128>}, {pipeline_mode = #tpu.pipeline_mode<synchronous>, transform_indices = @transform_2, window_bounds = array<i64: 1, 128>}, {pipeline_mode = #tpu.pipeline_mode<synchronous>, transform_indices = @transform_3, window_bounds = array<i64: 128, 128>}, {pipeline_mode = #tpu.pipeline_mode<synchronous>, transform_indices = @transform_4, window_bounds = array<i64: 1, 128>}, {pipeline_mode = #tpu.pipeline_mode<synchronous>, transform_indices = @transform_5, window_bounds = array<i64: 128, 128>}, {pipeline_mode = #tpu.pipeline_mode<synchronous>, transform_indices = @transform_6, window_bounds = array<i64: 1, 128>}, {pipeline_mode = #tpu.pipeline_mode<synchronous>, transform_indices = @transform_7, window_bounds = array<i64: 128, 128>}, {pipeline_mode = #tpu.pipeline_mode<synchronous>, transform_indices = @transform_8, window_bounds = array<i64: 1, 128>}, {transform_indices = @transform_9, window_bounds = array<i64: 2, 128>}, {transform_indices = @transform_10, window_bounds = array<i64: 2, 128>}]} {
    %c0 = arith.constant 0 : index
    %c0_0 = arith.constant 0 : index
    %0 = vector.load %arg1[%c0, %c0_0] : memref<2x64xf32, #tpu.memory_space<vmem>>, vector<2x64xf32>
    %1 = arith.truncf %0 : vector<2x64xf32> to vector<2x64xbf16>
    %c0_1 = arith.constant 0 : index
    %c0_2 = arith.constant 0 : index
    %2 = vector.load %arg2[%c0_1, %c0_2] : memref<64x128xbf16, #tpu.memory_space<vmem>>, vector<64x128xbf16>
    %c0_3 = arith.constant 0 : index
    %c0_4 = arith.constant 0 : index
    %3 = vector.load %arg3[%c0_3, %c0_4] : memref<1x128xf32, #tpu.memory_space<vmem>>, vector<1x128xf32>
    %cst = arith.constant dense<0.000000e+00> : vector<2x128xf32>
    %4 = tpu.matmul %1, %2, %cst {dimension_numbers = #tpu.dot_dimension_numbers<[1], [0], [0], [1], [0, 0, 1, 1], [], []>} : vector<2x64xbf16>, vector<64x128xbf16>, vector<2x128xf32> -> vector<2x128xf32>
    %5 = vector.broadcast %3 : vector<1x128xf32> to vector<2x128xf32>
    %6 = arith.addf %4, %5 : vector<2x128xf32>
    %cst_5 = arith.constant 0.000000e+00 : f32
    %7 = vector.broadcast %cst_5 : f32 to vector<2x128xf32>
    %8 = arith.maximumf %6, %7 : vector<2x128xf32>
    %9 = arith.truncf %8 : vector<2x128xf32> to vector<2x128xbf16>
    %c0_6 = arith.constant 0 : index
    %c0_7 = arith.constant 0 : index
    %10 = vector.load %arg4[%c0_6, %c0_7] : memref<128x128xbf16, #tpu.memory_space<vmem>>, vector<128x128xbf16>
    %c0_8 = arith.constant 0 : index
    %c0_9 = arith.constant 0 : index
    %11 = vector.load %arg5[%c0_8, %c0_9] : memref<1x128xf32, #tpu.memory_space<vmem>>, vector<1x128xf32>
    %cst_10 = arith.constant dense<0.000000e+00> : vector<2x128xf32>
    %12 = tpu.matmul %9, %10, %cst_10 {dimension_numbers = #tpu.dot_dimension_numbers<[1], [0], [0], [1], [0, 0, 1, 1], [], []>} : vector<2x128xbf16>, vector<128x128xbf16>, vector<2x128xf32> -> vector<2x128xf32>
    %13 = vector.broadcast %11 : vector<1x128xf32> to vector<2x128xf32>
    %14 = arith.addf %12, %13 : vector<2x128xf32>
    %cst_11 = arith.constant 0.000000e+00 : f32
    %15 = vector.broadcast %cst_11 : f32 to vector<2x128xf32>
    %16 = arith.maximumf %14, %15 : vector<2x128xf32>
    %17 = arith.truncf %16 : vector<2x128xf32> to vector<2x128xbf16>
    %c0_12 = arith.constant 0 : index
    %c0_13 = arith.constant 0 : index
    %18 = vector.load %arg6[%c0_12, %c0_13] : memref<128x128xbf16, #tpu.memory_space<vmem>>, vector<128x128xbf16>
    %c0_14 = arith.constant 0 : index
    %c0_15 = arith.constant 0 : index
    %19 = vector.load %arg7[%c0_14, %c0_15] : memref<1x128xf32, #tpu.memory_space<vmem>>, vector<1x128xf32>
    %cst_16 = arith.constant dense<0.000000e+00> : vector<2x128xf32>
    %20 = tpu.matmul %17, %18, %cst_16 {dimension_numbers = #tpu.dot_dimension_numbers<[1], [0], [0], [1], [0, 0, 1, 1], [], []>} : vector<2x128xbf16>, vector<128x128xbf16>, vector<2x128xf32> -> vector<2x128xf32>
    %21 = vector.broadcast %19 : vector<1x128xf32> to vector<2x128xf32>
    %22 = arith.addf %20, %21 : vector<2x128xf32>
    %cst_17 = arith.constant 0.000000e+00 : f32
    %23 = vector.broadcast %cst_17 : f32 to vector<2x128xf32>
    %24 = arith.maximumf %22, %23 : vector<2x128xf32>
    %25 = arith.truncf %24 : vector<2x128xf32> to vector<2x128xbf16>
    %26 = arith.truncf %24 : vector<2x128xf32> to vector<2x128xbf16>
    %c0_18 = arith.constant 0 : index
    %c0_19 = arith.constant 0 : index
    %27 = vector.load %arg11[%c0_18, %c0_19] : memref<2x128xbf16, #tpu.memory_space<vmem>>, vector<2x128xbf16>
    tpu.vector_store %arg11[%c0_18, %c0_19], %26 {strides = array<i32>} : memref<2x128xbf16, #tpu.memory_space<vmem>>, vector<2x128xbf16>,
    %c0_20 = arith.constant 0 : index
    %c0_21 = arith.constant 0 : index
    %28 = vector.load %arg8[%c0_20, %c0_21] : memref<128x128xbf16, #tpu.memory_space<vmem>>, vector<128x128xbf16>
    %c0_22 = arith.constant 0 : index
    %c0_23 = arith.constant 0 : index
    %29 = vector.load %arg9[%c0_22, %c0_23] : memref<1x128xf32, #tpu.memory_space<vmem>>, vector<1x128xf32>
    %cst_24 = arith.constant dense<0.000000e+00> : vector<2x128xf32>
    %30 = tpu.matmul %25, %28, %cst_24 {dimension_numbers = #tpu.dot_dimension_numbers<[1], [0], [0], [1], [0, 0, 1, 1], [], []>} : vector<2x128xbf16>, vector<128x128xbf16>, vector<2x128xf32> -> vector<2x128xf32>
    %31 = vector.broadcast %29 : vector<1x128xf32> to vector<2x128xf32>
    %32 = arith.addf %30, %31 : vector<2x128xf32>
    %c0_25 = arith.constant 0 : index
    %c0_26 = arith.constant 0 : index
    %33 = vector.load %arg10[%c0_25, %c0_26] : memref<2x128xf32, #tpu.memory_space<vmem>>, vector<2x128xf32>
    tpu.vector_store %arg10[%c0_25, %c0_26], %32 {strides = array<i32>} : memref<2x128xf32, #tpu.memory_space<vmem>>, vector<2x128xf32>,
    return
  }
  func.func @transform_0(%arg0: i32) -> (i32, i32) {
    %c0_i32 = arith.constant 0 : i32
    %c0_i32_0 = arith.constant 0 : i32
    return %arg0, %c0_i32 : i32, i32
  }
  func.func @transform_1(%arg0: i32) -> (i32, i32) {
    %c0_i32 = arith.constant 0 : i32
    %c0_i32_0 = arith.constant 0 : i32
    %c0_i32_1 = arith.constant 0 : i32
    return %c0_i32, %c0_i32_0 : i32, i32
  }
  func.func @transform_2(%arg0: i32) -> (i32, i32) {
    %c0_i32 = arith.constant 0 : i32
    %c0_i32_0 = arith.constant 0 : i32
    %c0_i32_1 = arith.constant 0 : i32
    return %c0_i32, %c0_i32_0 : i32, i32
  }
  func.func @transform_3(%arg0: i32) -> (i32, i32) {
    %c0_i32 = arith.constant 0 : i32
    %c0_i32_0 = arith.constant 0 : i32
    %c0_i32_1 = arith.constant 0 : i32
    return %c0_i32, %c0_i32_0 : i32, i32
  }
  func.func @transform_4(%arg0: i32) -> (i32, i32) {
    %c0_i32 = arith.constant 0 : i32
    %c0_i32_0 = arith.constant 0 : i32
    %c0_i32_1 = arith.constant 0 : i32
    return %c0_i32, %c0_i32_0 : i32, i32
  }
  func.func @transform_5(%arg0: i32) -> (i32, i32) {
    %c0_i32 = arith.constant 0 : i32
    %c0_i32_0 = arith.constant 0 : i32
    %c0_i32_1 = arith.constant 0 : i32
    return %c0_i32, %c0_i32_0 : i32, i32
  }
  func.func @transform_6(%arg0: i32) -> (i32, i32) {
    %c0_i32 = arith.constant 0 : i32
    %c0_i32_0 = arith.constant 0 : i32
    %c0_i32_1 = arith.constant 0 : i32
    return %c0_i32, %c0_i32_0 : i32, i32
  }
  func.func @transform_7(%arg0: i32) -> (i32, i32) {
    %c0_i32 = arith.constant 0 : i32
    %c0_i32_0 = arith.constant 0 : i32
    %c0_i32_1 = arith.constant 0 : i32
    return %c0_i32, %c0_i32_0 : i32, i32
  }
  func.func @transform_8(%arg0: i32) -> (i32, i32) {
    %c0_i32 = arith.constant 0 : i32
    %c0_i32_0 = arith.constant 0 : i32
    %c0_i32_1 = arith.constant 0 : i32
    return %c0_i32, %c0_i32_0 : i32, i32
  }
  func.func @transform_9(%arg0: i32) -> (i32, i32) {
    %c0_i32 = arith.constant 0 : i32
    %c0_i32_0 = arith.constant 0 : i32
    return %arg0, %c0_i32 : i32, i32
  }
  func.func @transform_10(%arg0: i32) -> (i32, i32) {
    %c0_i32 = arith.constant 0 : i32
    %c0_i32_0 = arith.constant 0 : i32
    return %arg0, %c0_i32 : i32, i32
  }
}

</mosaic_0001>

<bundles_post_ra>
// kernel: tpu_custom_call.1
= control target key start
LH: loop header
LB: loop body
LE: loop exit
PB: predicated region body
PF: predicated region fallthrough
CT: control target
= control target key end

     0   :  { %16 = vsyncpa [#allocation3], 0  ;;  %s1110_s0 = inlined_call_operand.hbm [shape: f32[2,64], index: 0, kind: input, shape index: {}]   ;;  %s1111_s1 = inlined_call_operand.hbm [shape: bf16[64,128], index: 1, kind: input, shape index: {}]   ;;  %s1112_s2 = inlined_call_operand.vmem [shape: f32[1,128], index: 2, kind: input, shape index: {}]   ;;  %s1113_s3 = inlined_call_operand.hbm [shape: bf16[128,128], index: 3, kind: input, shape index: {}]   ;;  %s1114_s4 = inlined_call_operand.vmem [shape: f32[1,128], index: 4, kind: input, shape index: {}]   ;;  %s1115_s5 = inlined_call_operand.hbm [shape: bf16[128,128], index: 5, kind: input, shape index: {}]   ;;  %s1116_s6 = inlined_call_operand.vmem [shape: f32[1,128], index: 6, kind: input, shape index: {}]   ;;  %s1117_s7 = inlined_call_operand.hbm [shape: bf16[128,128], index: 7, kind: input, shape index: {}]   ;;  %s1118_s8 = inlined_call_operand.vmem [shape: f32[1,128], index: 8, kind: input, shape index: {}]   ;;  %s1119_s9 = inlined_call_operand.hbm [shape: f32[2,128], index: 9, kind: output, shape index: {0}]   ;;  %s1120_s10 = inlined_call_operand.hbm [shape: bf16[2,128], index: 10, kind: output, shape index: {1}]  }
   0x1   :  { %17 = vsyncpa [#allocation6], 0 }
   0x2   :  { %18 = vsyncpa [#allocation9], 0 }
   0x3   :  { %19 = vsyncpa [#allocation4], 0 }
   0x4   :  { %20 = vsyncpa [#allocation13], 0  ;;  %s900_s13 = smov [#allocation5]   ;;  %s736_s17 = scalar_lea.hbm %s1111_s1, 512 }
   0x5   :  { %s36_s14 = sshll.u32 %s900_s13, 4  ;;  %p737_p0 = scmp.ne.s32.totalorder %s1111_s1, %s736_s17  ;;  %s37_s14 = int_to_ptr.vmem [resolvable:$true] %s36_s14 }
   0x6   :  { %p740_p1 = scmp.lt.u32.totalorder %s736_s17, %s1111_s1 }
   0x8   :  { %p742_p2 = pnand %p740_p1, %p737_p0 }
   0xa   :  { %745 = shalt.err (!%p742_p2)
}
   0xb   :  { %s746_s22 = scalar_lea.vmem %s37_s14, 512  ;;  %p751_p4 = scmp.lt.s32.totalorder %s37_s14, %s37_s14 }
   0xc   :  { %p747_p3 = scmp.ne.s32.totalorder %s37_s14, %s746_s22  ;;  %p752_p5 = scmp.lt.s32.totalorder %s746_s22, %s746_s22 }
   0xe   :  { %p753_p6 = por %p752_p5, %p751_p4 }
  0x10   :  { %p754_p7 = pnand %p753_p6, %p747_p3 }
  0x12   :  { %757 = shalt.err (!%p754_p7)
}
  0x13   :  { %s901_s23 = smov 64   ;;  %s902_s24 = smov 4  }
  0x14   :  { %42 = dma.hbm_to_vmem [thread:$0]  %s1111_s1, 512, %s37_s14, [#allocation6], %s901_s23, %s901_s23, %s902_s24  }
  0x15   :  { %s903_s27 = smov [#allocation8]   ;;  %s904_s29 = smov [#allocation2]  }
  0x16   :  { %s64_s28 = sshll.u32 %s903_s27, 4  ;;  %s27_s30 = sshll.u32 %s904_s29, 4  ;;  %s65_s28 = int_to_ptr.vmem [resolvable:$true] %s64_s28  ;;  %s28_s30 = int_to_ptr.vmem [resolvable:$true] %s27_s30 }
  0x17   :  { %s758_s13 = scalar_lea.hbm %s1115_s5, 1024 }
  0x18   :  { %p759_p8 = scmp.ne.s32.totalorder %s1115_s5, %s758_s13  ;;  %p762_p9 = scmp.lt.u32.totalorder %s758_s13, %s1115_s5 }
  0x1a   :  { %p764_p10 = pnand %p762_p9, %p759_p8 }
  0x1c   :  { %767 = shalt.err (!%p764_p10)
}
  0x1d   :  { %s768_s1 = scalar_lea.vmem %s65_s28, 1024  ;;  %p773_p12 = scmp.lt.s32.totalorder %s65_s28, %s65_s28 }
  0x1e   :  { %p769_p11 = scmp.ne.s32.totalorder %s65_s28, %s768_s1  ;;  %p774_p13 = scmp.lt.s32.totalorder %s768_s1, %s768_s1 }
  0x20   :  { %p775_p0 = por %p774_p13, %p773_p12 }
  0x22   :  { %p776_p1 = pnand %p775_p0, %p769_p11 }
  0x24   :  { %779 = shalt.err (!%p776_p1)
}
  0x25   :  { %70 = dma.hbm_to_vmem [thread:$0]  %s1115_s5, 1024, %s65_s28, [#allocation9], %s901_s23, %s901_s23, %s902_s24  }
  0x26   :  { %s780_s22 = scalar_lea.hbm %s1110_s0, 32 }
  0x27   :  { %p781_p2 = scmp.ne.s32.totalorder %s1110_s0, %s780_s22  ;;  %p784_p3 = scmp.lt.u32.totalorder %s780_s22, %s1110_s0 }
  0x29   :  { %p786_p4 = pnand %p784_p3, %p781_p2 }
  0x2b   :  { %789 = shalt.err (!%p786_p4)
}
  0x2c   :  { %s790_s11 = scalar_lea.vmem %s28_s30, 32  ;;  %p795_p6 = scmp.lt.s32.totalorder %s28_s30, %s28_s30 }
  0x2d   :  { %p791_p5 = scmp.ne.s32.totalorder %s28_s30, %s790_s11  ;;  %p796_p7 = scmp.lt.s32.totalorder %s790_s11, %s790_s11 }
  0x2f   :  { %p797_p8 = por %p796_p7, %p795_p6 }
  0x31   :  { %p798_p9 = pnand %p797_p8, %p791_p5 }
  0x33   :  { %801 = shalt.err (!%p798_p9)
}
  0x34   :  { %30 = dma.hbm_to_vmem [thread:$0]  %s1110_s0, 32, %s28_s30, [#allocation3]  }
  0x35   :  { %s905_s12 = smov [#allocation7]   ;;  %s906_s15 = smov [#allocation10]  }
  0x36   :  { %s50_s13 = sshll.u32 %s905_s12, 4  ;;  %s78_s16 = sshll.u32 %s906_s15, 4  ;;  %s51_s13 = int_to_ptr.vmem [resolvable:$true] %s50_s13  ;;  %s79_s16 = int_to_ptr.vmem [resolvable:$true] %s78_s16 }
  0x37   :  { %s802_s1 = scalar_lea.hbm %s1113_s3, 1024 }
  0x38   :  { %p803_p10 = scmp.ne.s32.totalorder %s1113_s3, %s802_s1  ;;  %p806_p11 = scmp.lt.u32.totalorder %s802_s1, %s1113_s3 }
  0x3a   :  { %p808_p12 = pnand %p806_p11, %p803_p10 }
  0x3c   :  { %811 = shalt.err (!%p808_p12)
}
  0x3d   :  { %s812_s0 = scalar_lea.vmem %s51_s13, 1024  ;;  %p817_p0 = scmp.lt.s32.totalorder %s51_s13, %s51_s13 }
  0x3e   :  { %p813_p13 = scmp.ne.s32.totalorder %s51_s13, %s812_s0  ;;  %p818_p1 = scmp.lt.s32.totalorder %s812_s0, %s812_s0 }
  0x40   :  { %p819_p2 = por %p818_p1, %p817_p0 }
  0x42   :  { %p820_p3 = pnand %p819_p2, %p813_p13 }
  0x44   :  { %823 = shalt.err (!%p820_p3)
}
  0x45   :  { %56 = dma.hbm_to_vmem [thread:$0]  %s1113_s3, 1024, %s51_s13, [#allocation6], %s901_s23, %s901_s23, %s902_s24  }
  0x46   :  { %s824_s27 = scalar_lea.hbm %s1117_s7, 1024 }
  0x47   :  { %p825_p4 = scmp.ne.s32.totalorder %s1117_s7, %s824_s27  ;;  %p828_p5 = scmp.lt.u32.totalorder %s824_s27, %s1117_s7 }
  0x49   :  { %p830_p6 = pnand %p828_p5, %p825_p4 }
  0x4b   :  { %833 = shalt.err (!%p830_p6)
}
  0x4c   :  { %s834_s12 = scalar_lea.vmem %s79_s16, 1024  ;;  %p839_p8 = scmp.lt.s32.totalorder %s79_s16, %s79_s16 }
  0x4d   :  { %p835_p7 = scmp.ne.s32.totalorder %s79_s16, %s834_s12  ;;  %p840_p9 = scmp.lt.s32.totalorder %s834_s12, %s834_s12 }
  0x4f   :  { %p841_p10 = por %p840_p9, %p839_p8 }
  0x51   :  { %p842_p11 = pnand %p841_p10, %p835_p7 }
  0x53   :  { %845 = shalt.err (!%p842_p11)
}
  0x54   :  { %84 = dma.hbm_to_vmem [thread:$0]  %s1117_s7, 1024, %s79_s16, [#allocation9], %s901_s23, %s901_s23, %s902_s24  }
  0x55   :  { %890 = dma.done.wait [#allocation3], 32  }
  0x56   :  { %891 = vsyncadd [#allocation3], 4294967264 }
  0x57   :  { %892 = dma.done.wait [#allocation6], 1536  }
  0x58   :  { %893 = vsyncadd [#allocation6], 4294965760 }
  0x59   :  { %894 = dma.done.wait [#allocation9], 2048  }
  0x5a   :  { %895 = vsyncadd [#allocation9], 4294965248  ;;  %v907_v0 = vmov 0.0   ;;  %vm908_vm0 = vmmov 0   ;;  %v708_v1 = vld [vmem:[#allocation5] sm:$0xff]   ;;  %v709_v2 = vld [vmem:[#allocation5 + $0x8] sm:$0xff]  }
  0x5b   :  { %625 = vmatprep.subr.bf16.mxu0 %v907_v0  ;;  %633 = vmatprep.mubr.msk.bf16.mxu0 %vm908_vm0, %v907_v0  ;;  %v712_v3 = vld [vmem:[#allocation7] sm:$0xff]   ;;  %v710_v4 = vld [vmem:[#allocation5 + $0x10] sm:$0xff]   ;;  %v713_v5 = vld [vmem:[#allocation7 + $0x8] sm:$0xff]   ;;  %vm144_vm1 = vcmask 523264  }
  0x5c   :  { %637 = vmatprep.subr.bf16.mxu1 %v907_v0  ;;  %653 = vmatprep.mubr.msk.bf16.mxu1 %vm908_vm0, %v907_v0  ;;  %v711_v6 = vld [vmem:[#allocation5 + $0x18] sm:$0xff]   ;;  %v714_v8 = vld [vmem:[#allocation7 + $0x10] sm:$0xff]   ;;  %v716_v11 = vld [vmem:[#allocation7 + $0x20] sm:$0xff]  }
  0x5d   :  { %626 = vmatpush3.bf16.msra.mxu0 %v708_v1  ;;  %638 = vmatpush3.bf16.msra.mxu1 %v712_v3  ;;  %v103_v7 = vld [vmem:[#allocation2] sm:$0x3]  ;;  %v717_v12 = vld [vmem:[#allocation7 + $0x28] sm:$0xff]   ;;  %v718_v13 = vld [vmem:[#allocation7 + $0x30] sm:$0xff]  }
  0x5e   :  { %627 = vmatprep.subr.bf16.mxu0 %v907_v0  ;;  %639 = vmatprep.subr.bf16.mxu1 %v907_v0  ;;  %v104_v9 = vpack.c.bf16 %v103_v7, %v103_v7  ;;  %v715_v10 = vld [vmem:[#allocation7 + $0x18] sm:$0xff]   ;;  %v720_v15 = vld [vmem:[#allocation8] sm:$0xff]   ;;  %v721_v16 = vld [vmem:[#allocation8 + $0x8] sm:$0xff]  }
  0x5f   :  { %v719_v14 = vld [vmem:[#allocation7 + $0x38] sm:$0xff]   ;;  %v722_v17 = vld [vmem:[#allocation8 + $0x10] sm:$0xff]   ;;  %v724_v19 = vld [vmem:[#allocation8 + $0x20] sm:$0xff]  }
  0x60   :  { %v723_v18 = vld [vmem:[#allocation8 + $0x18] sm:$0xff]   ;;  %v725_v20 = vld [vmem:[#allocation8 + $0x28] sm:$0xff]   ;;  %v726_v29 = vld [vmem:[#allocation8 + $0x30] sm:$0xff]  }
  0x61   :  { %628 = vmatpush3.bf16.msra.mxu0 %v709_v2  ;;  %640 = vmatpush3.bf16.msra.mxu1 %v713_v5  ;;  %v560_v21 = vld [vmem:[%s1112_s2] ss:$0 sm:$0xff]  ;;  %v728_v31 = vld [vmem:[#allocation10] sm:$0xff]   ;;  %v729_v32 = vld [vmem:[#allocation10 + $0x8] sm:$0xff]  }
  0x62   :  { %629 = vmatprep.subr.bf16.mxu0 %v907_v0  ;;  %641 = vmatprep.subr.bf16.mxu1 %v907_v0  ;;  %v727_v30 = vld [vmem:[#allocation8 + $0x38] sm:$0xff]   ;;  %v730_v33 = vld [vmem:[#allocation10 + $0x10] sm:$0xff]   ;;  %v732_v35 = vld [vmem:[#allocation10 + $0x20] sm:$0xff]  }
  0x63   :  { %v731_v34 = vld [vmem:[#allocation10 + $0x18] sm:$0xff]   ;;  %v733_v36 = vld [vmem:[#allocation10 + $0x28] sm:$0xff]   ;;  %v734_v45 = vld [vmem:[#allocation10 + $0x30] sm:$0xff]  }
  0x64   :  { %v566_v37 = vld [vmem:[%s1114_s4] ss:$0 sm:$0xff]  ;;  %s909_s4 = smov [#allocation12]  }
  0x65   :  { %630 = vmatpush3.bf16.msra.mxu0 %v710_v4  ;;  %642 = vmatpush3.bf16.msra.mxu1 %v714_v8  ;;  %v735_v46 = vld [vmem:[#allocation10 + $0x38] sm:$0xff]   ;;  %s545_s17 = sshll.u32 %s909_s4, 4  ;;  %s546_s17 = int_to_ptr.vmem [resolvable:$true] %s545_s17 }
  0x66   :  { %631 = vmatprep.subr.bf16.mxu0 %v907_v0  ;;  %643 = vmatprep.subr.bf16.mxu1 %v907_v0  ;;  %v575_v47 = vld [vmem:[%s1116_s6] ss:$0 sm:$0xff]  ;;  %s846_s18 = scalar_lea.vmem %s546_s17, 16  ;;  %s850_s1 = scalar_lea.vmem %s546_s17, 32 }
  0x67   :  { %p847_p12 = scmp.ne.s32.totalorder %s546_s17, %s846_s18  ;;  %p851_p13 = scmp.lt.s32.totalorder %s546_s17, %s546_s17 }
  0x68   :  { %p852_p0 = scmp.lt.s32.totalorder %s850_s1, %s846_s18 }
  0x69   :  { %632 = vmatpush3.bf16.msra.mxu0 %v711_v6  ;;  %644 = vmatpush3.bf16.msra.mxu1 %v715_v10 }
  0x6a   :  { %657 = vmatprep.subr.bf16.mxu0 %v907_v0  ;;  %645 = vmatprep.subr.bf16.mxu1 %v907_v0  ;;  %p853_p1 = por %p852_p0, %p851_p13 }
  0x6c   :  { %634 = vmatmul.mubr.msk.bf16.vlgmr.msra.gmra.mrb[0].mxu0 %vm144_vm1, %v104_v9  ;;  %p854_p2 = pnand %p853_p1, %p847_p12 }
  0x6d   :  { %673 = vmatprep.mubr.msk.bf16.mxu0 %vm908_vm0, %v907_v0  ;;  %646 = vmatpush3.bf16.msra.mxu1 %v716_v11 }
  0x6e   :  { %647 = vmatprep.subr.bf16.mxu1 %v907_v0  ;;  %658 = vmatpush3.bf16.msra.mxu0 %v720_v15 }
  0x6f   :  { %659 = vmatprep.subr.bf16.mxu0 %v907_v0 }
  0x71   :  { %648 = vmatpush3.bf16.msra.mxu1 %v717_v12 }
  0x72   :  { %649 = vmatprep.subr.bf16.mxu1 %v907_v0  ;;  %660 = vmatpush3.bf16.msra.mxu0 %v721_v16 }
  0x73   :  { %661 = vmatprep.subr.bf16.mxu0 %v907_v0 }
  0x75   :  { %650 = vmatpush3.bf16.msra.mxu1 %v718_v13 }
  0x76   :  { %651 = vmatprep.subr.bf16.mxu1 %v907_v0  ;;  %662 = vmatpush3.bf16.msra.mxu0 %v722_v17 }
  0x77   :  { %663 = vmatprep.subr.bf16.mxu0 %v907_v0 }
  0x79   :  { %652 = vmatpush3.bf16.msra.mxu1 %v719_v14 }
  0x7a   :  { %677 = vmatprep.subr.bf16.mxu1 %v907_v0  ;;  %664 = vmatpush3.bf16.msra.mxu0 %v723_v18 }
  0x7b   :  { %665 = vmatprep.subr.bf16.mxu0 %v907_v0 }
  0x7e   :  { %666 = vmatpush3.bf16.msra.mxu0 %v724_v19 }
  0x7f   :  { %667 = vmatprep.subr.bf16.mxu0 %v907_v0 }
  0x82   :  { %668 = vmatpush3.bf16.msra.mxu0 %v725_v20 }
  0x83   :  { %669 = vmatprep.subr.bf16.mxu0 %v907_v0 }
  0x86   :  { %670 = vmatpush3.bf16.msra.mxu0 %v726_v29 }
  0x87   :  { %671 = vmatprep.subr.bf16.mxu0 %v907_v0 }
  0x8a   :  { %672 = vmatpush3.bf16.msra.mxu0 %v727_v30 }
 0x13f   :  { %v182_v22 = vpop.f32.mrb[0].mxu0 }
 0x140   :  { %v183_v23 = vadd.f32 %v560_v21, %v182_v22  ;;  %v635_v24 = vpop.f32.mrb[1].mxu0 }
 0x141   :  { %v185_v25 = vpop.f32.mrb[2].mxu0 }
 0x142   :  { %v188_v26 = vmax.f32 %v183_v23, 0.0  ;;  %v636_v27 = vpop.f32.mrb[3].mxu0 }
 0x144   :  { %v189_v28 = vpack.c.bf16 %v188_v26, %v188_v26 }
 0x146   :  { %654 = vmatmul.mubr.bf16.vlgmr.msra.gmra.mrb[0].mxu1 %v189_v28 }
 0x147   :  { %693 = vmatprep.mubr.msk.bf16.mxu1 %vm908_vm0, %v907_v0  ;;  %678 = vmatpush3.bf16.msra.mxu1 %v728_v31 }
 0x148   :  { %679 = vmatprep.subr.bf16.mxu1 %v907_v0 }
 0x14b   :  { %680 = vmatpush3.bf16.msra.mxu1 %v729_v32 }
 0x14c   :  { %681 = vmatprep.subr.bf16.mxu1 %v907_v0 }
 0x14f   :  { %682 = vmatpush3.bf16.msra.mxu1 %v730_v33 }
 0x150   :  { %683 = vmatprep.subr.bf16.mxu1 %v907_v0 }
 0x153   :  { %684 = vmatpush3.bf16.msra.mxu1 %v731_v34 }
 0x154   :  { %685 = vmatprep.subr.bf16.mxu1 %v907_v0 }
 0x157   :  { %686 = vmatpush3.bf16.msra.mxu1 %v732_v35 }
 0x158   :  { %687 = vmatprep.subr.bf16.mxu1 %v907_v0 }
 0x15b   :  { %688 = vmatpush3.bf16.msra.mxu1 %v733_v36 }
 0x15c   :  { %689 = vmatprep.subr.bf16.mxu1 %v907_v0 }
 0x15f   :  { %690 = vmatpush3.bf16.msra.mxu1 %v734_v45 }
 0x160   :  { %691 = vmatprep.subr.bf16.mxu1 %v907_v0 }
 0x163   :  { %692 = vmatpush3.bf16.msra.mxu1 %v735_v46 }
 0x219   :  { %v295_v38 = vpop.f32.mrb[0].mxu1 }
 0x21a   :  { %v296_v39 = vadd.f32 %v566_v37, %v295_v38  ;;  %v655_v40 = vpop.f32.mrb[1].mxu1 }
 0x21b   :  { %v298_v41 = vpop.f32.mrb[2].mxu1 }
 0x21c   :  { %v301_v42 = vmax.f32 %v296_v39, 0.0  ;;  %v656_v43 = vpop.f32.mrb[3].mxu1 }
 0x21e   :  { %v302_v44 = vpack.c.bf16 %v301_v42, %v301_v42 }
 0x220   :  { %674 = vmatmul.mubr.bf16.vlgmr.msra.gmra.mrb[4].mxu0 %v302_v44 }
 0x2f3   :  { %v408_v48 = vpop.f32.mrb[4].mxu0 }
 0x2f4   :  { %v409_v49 = vadd.f32 %v575_v47, %v408_v48  ;;  %v675_v50 = vpop.f32.mrb[5].mxu0 }
 0x2f5   :  { %v411_v51 = vpop.f32.mrb[6].mxu0 }
 0x2f6   :  { %v414_v52 = vmax.f32 %v409_v49, 0.0  ;;  %v676_v53 = vpop.f32.mrb[7].mxu0 }
 0x2f8   :  { %v415_v54 = vpack.c.bf16 %v414_v52, %v414_v52 }
 0x2fa   :  { %416 = vst [vmem:[#allocation12] sm:$0x1] %v415_v54  ;;  %694 = vmatmul.mubr.bf16.vlgmr.msra.gmra.mrb[4].mxu1 %v415_v54 }
 0x2fb   :  { %857 = shalt.err (!%p854_p2)
}
 0x2fc   :  { %s858_s19 = scalar_lea.hbm %s1120_s10, 16 }
 0x2fd   :  { %p859_p3 = scmp.ne.s32.totalorder %s1120_s10, %s858_s19  ;;  %p862_p4 = scmp.lt.u32.totalorder %s858_s19, %s1120_s10 }
 0x2ff   :  { %p864_p5 = pnand %p862_p4, %p859_p3 }
 0x301   :  { %867 = shalt.err (!%p864_p5)
}
 0x302   :  { %548 = dma.vmem_to_hbm [thread:$0]  %s546_s17, 16, %s1120_s10, [#allocation13]   ;;  %v584_v55 = vld [vmem:[%s1118_s8] ss:$0 sm:$0xff] }
 0x303   :  { %s910_s29 = smov [#allocation11]  }
 0x304   :  { %s535_s11 = sshll.u32 %s910_s29, 4  ;;  %s536_s11 = int_to_ptr.vmem [resolvable:$true] %s535_s11 }
 0x305   :  { %s868_s5 = scalar_lea.vmem %s536_s11, 32  ;;  %p873_p7 = scmp.lt.s32.totalorder %s536_s11, %s536_s11 }
 0x306   :  { %p869_p6 = scmp.ne.s32.totalorder %s536_s11, %s868_s5  ;;  %p874_p8 = scmp.lt.s32.totalorder %s868_s5, %s868_s5 }
 0x308   :  { %p875_p9 = por %p874_p8, %p873_p7 }
 0x30a   :  { %p876_p10 = pnand %p875_p9, %p869_p6 }
 0x3cd   :  { %v522_v56 = vpop.f32.mrb[4].mxu1 }
 0x3ce   :  { %v523_v57 = vadd.f32 %v584_v55, %v522_v56  ;;  %v695_v58 = vpop.f32.mrb[5].mxu1 }
 0x3cf   :  { %v525_v59 = vpop.f32.mrb[6].mxu1 }
 0x3d0   :  { %528 = vst [vmem:[#allocation11] sm:$0x3] %v523_v57  ;;  %v696_v60 = vpop.f32.mrb[7].mxu1 }
 0x3d1   :  { %879 = shalt.err (!%p876_p10)
}
 0x3d2   :  { %s880_s8 = scalar_lea.hbm %s1119_s9, 32 }
 0x3d3   :  { %p881_p11 = scmp.ne.s32.totalorder %s1119_s9, %s880_s8  ;;  %p884_p12 = scmp.lt.u32.totalorder %s880_s8, %s1119_s9 }
 0x3d5   :  { %p886_p13 = pnand %p884_p12, %p881_p11 }
 0x3d7   :  { %889 = shalt.err (!%p886_p13)
}
 0x3d8   :  { %538 = dma.vmem_to_hbm [thread:$0]  %s536_s11, 32, %s1119_s9, [#allocation4]  }
 0x3d9   :  { %896 = dma.done.wait [#allocation4], 32  }
 0x3da   :  { %897 = vsyncadd [#allocation4], 4294967264 }
 0x3db   :  { %898 = dma.done.wait [#allocation13], 16  }
 0x3dc   :  { %899 = vsyncadd [#allocation13], 4294967280 }
 0x3dd   :  { %555 = vsyncpa [#allocation3], 1 }
 0x3de   :  { %556 = vsyncpa [#allocation6], 1 }
 0x3df   :  { %557 = vsyncpa [#allocation9], 1 }
 0x3e0   :  { %558 = vsyncpa [#allocation4], 1 }
 0x3e1   :  { %559 = vsyncpa [#allocation13], 1 }

// kernel: tpu_custom_call.1
= control target key start
LH: loop header
LB: loop body
LE: loop exit
PB: predicated region body
PF: predicated region fallthrough
CT: control target
= control target key end

     0   :  { %16 = vsyncpa [#allocation3], 0  ;;  %s1110_s0 = inlined_call_operand.hbm [shape: f32[2,64], index: 0, kind: input, shape index: {}]   ;;  %s1111_s1 = inlined_call_operand.hbm [shape: bf16[64,128], index: 1, kind: input, shape index: {}]   ;;  %s1112_s2 = inlined_call_operand.vmem [shape: f32[1,128], index: 2, kind: input, shape index: {}]   ;;  %s1113_s3 = inlined_call_operand.hbm [shape: bf16[128,128], index: 3, kind: input, shape index: {}]   ;;  %s1114_s4 = inlined_call_operand.vmem [shape: f32[1,128], index: 4, kind: input, shape index: {}]   ;;  %s1115_s5 = inlined_call_operand.hbm [shape: bf16[128,128], index: 5, kind: input, shape index: {}]   ;;  %s1116_s6 = inlined_call_operand.vmem [shape: f32[1,128], index: 6, kind: input, shape index: {}]   ;;  %s1117_s7 = inlined_call_operand.hbm [shape: bf16[128,128], index: 7, kind: input, shape index: {}]   ;;  %s1118_s8 = inlined_call_operand.vmem [shape: f32[1,128], index: 8, kind: input, shape index: {}]   ;;  %s1119_s9 = inlined_call_operand.hbm [shape: f32[2,128], index: 9, kind: output, shape index: {0}]   ;;  %s1120_s10 = inlined_call_operand.hbm [shape: bf16[2,128], index: 10, kind: output, shape index: {1}]  }
   0x1   :  { %17 = vsyncpa [#allocation6], 0 }
   0x2   :  { %18 = vsyncpa [#allocation9], 0 }
   0x3   :  { %19 = vsyncpa [#allocation4], 0 }
   0x4   :  { %20 = vsyncpa [#allocation13], 0  ;;  %s900_s13 = smov [#allocation5]   ;;  %s736_s17 = scalar_lea.hbm %s1111_s1, 512 }
   0x5   :  { %s36_s14 = sshll.u32 %s900_s13, 4  ;;  %p737_p0 = scmp.ne.s32.totalorder %s1111_s1, %s736_s17  ;;  %s37_s14 = int_to_ptr.vmem [resolvable:$true] %s36_s14 }
   0x6   :  { %p740_p1 = scmp.lt.u32.totalorder %s736_s17, %s1111_s1 }
   0x8   :  { %p742_p2 = pnand %p740_p1, %p737_p0 }
   0xa   :  { %745 = shalt.err (!%p742_p2)
}
   0xb   :  { %s746_s22 = scalar_lea.vmem %s37_s14, 512  ;;  %p751_p4 = scmp.lt.s32.totalorder %s37_s14, %s37_s14 }
   0xc   :  { %p747_p3 = scmp.ne.s32.totalorder %s37_s14, %s746_s22  ;;  %p752_p5 = scmp.lt.s32.totalorder %s746_s22, %s746_s22 }
   0xe   :  { %p753_p6 = por %p752_p5, %p751_p4 }
  0x10   :  { %p754_p7 = pnand %p753_p6, %p747_p3 }
  0x12   :  { %757 = shalt.err (!%p754_p7)
}
  0x13   :  { %s901_s23 = smov 64   ;;  %s902_s24 = smov 4  }
  0x14   :  { %42 = dma.hbm_to_vmem [thread:$0]  %s1111_s1, 512, %s37_s14, [#allocation6], %s901_s23, %s901_s23, %s902_s24  }
  0x15   :  { %s903_s27 = smov [#allocation8]   ;;  %s904_s29 = smov [#allocation2]  }
  0x16   :  { %s64_s28 = sshll.u32 %s903_s27, 4  ;;  %s27_s30 = sshll.u32 %s904_s29, 4  ;;  %s65_s28 = int_to_ptr.vmem [resolvable:$true] %s64_s28  ;;  %s28_s30 = int_to_ptr.vmem [resolvable:$true] %s27_s30 }
  0x17   :  { %s758_s13 = scalar_lea.hbm %s1115_s5, 1024 }
  0x18   :  { %p759_p8 = scmp.ne.s32.totalorder %s1115_s5, %s758_s13  ;;  %p762_p9 = scmp.lt.u32.totalorder %s758_s13, %s1115_s5 }
  0x1a   :  { %p764_p10 = pnand %p762_p9, %p759_p8 }
  0x1c   :  { %767 = shalt.err (!%p764_p10)
}
  0x1d   :  { %s768_s1 = scalar_lea.vmem %s65_s28, 1024  ;;  %p773_p12 = scmp.lt.s32.totalorder %s65_s28, %s65_s28 }
  0x1e   :  { %p769_p11 = scmp.ne.s32.totalorder %s65_s28, %s768_s1  ;;  %p774_p13 = scmp.lt.s32.totalorder %s768_s1, %s768_s1 }
  0x20   :  { %p775_p0 = por %p774_p13, %p773_p12 }
  0x22   :  { %p776_p1 = pnand %p775_p0, %p769_p11 }
  0x24   :  { %779 = shalt.err (!%p776_p1)
}
  0x25   :  { %70 = dma.hbm_to_vmem [thread:$0]  %s1115_s5, 1024, %s65_s28, [#allocation9], %s901_s23, %s901_s23, %s902_s24  }
  0x26   :  { %s780_s22 = scalar_lea.hbm %s1110_s0, 32 }
  0x27   :  { %p781_p2 = scmp.ne.s32.totalorder %s1110_s0, %s780_s22  ;;  %p784_p3 = scmp.lt.u32.totalorder %s780_s22, %s1110_s0 }
  0x29   :  { %p786_p4 = pnand %p784_p3, %p781_p2 }
  0x2b   :  { %789 = shalt.err (!%p786_p4)
}
  0x2c   :  { %s790_s11 = scalar_lea.vmem %s28_s30, 32  ;;  %p795_p6 = scmp.lt.s32.totalorder %s28_s30, %s28_s30 }
  0x2d   :  { %p791_p5 = scmp.ne.s32.totalorder %s28_s30, %s790_s11  ;;  %p796_p7 = scmp.lt.s32.totalorder %s790_s11, %s790_s11 }
  0x2f   :  { %p797_p8 = por %p796_p7, %p795_p6 }
  0x31   :  { %p798_p9 = pnand %p797_p8, %p791_p5 }
  0x33   :  { %801 = shalt.err (!%p798_p9)
}
  0x34   :  { %30 = dma.hbm_to_vmem [thread:$0]  %s1110_s0, 32, %s28_s30, [#allocation3]  }
  0x35   :  { %s905_s12 = smov [#allocation7]   ;;  %s906_s15 = smov [#allocation10]  }
  0x36   :  { %s50_s13 = sshll.u32 %s905_s12, 4  ;;  %s78_s16 = sshll.u32 %s906_s15, 4  ;;  %s51_s13 = int_to_ptr.vmem [resolvable:$true] %s50_s13  ;;  %s79_s16 = int_to_ptr.vmem [resolvable:$true] %s78_s16 }
  0x37   :  { %s802_s1 = scalar_lea.hbm %s1113_s3, 1024 }
  0x38   :  { %p803_p10 = scmp.ne.s32.totalorder %s1113_s3, %s802_s1  ;;  %p806_p11 = scmp.lt.u32.totalorder %s802_s1, %s1113_s3 }
  0x3a   :  { %p808_p12 = pnand %p806_p11, %p803_p10 }
  0x3c   :  { %811 = shalt.err (!%p808_p12)
}
  0x3d   :  { %s812_s0 = scalar_lea.vmem %s51_s13, 1024  ;;  %p817_p0 = scmp.lt.s32.totalorder %s51_s13, %s51_s13 }
  0x3e   :  { %p813_p13 = scmp.ne.s32.totalorder %s51_s13, %s812_s0  ;;  %p818_p1 = scmp.lt.s32.totalorder %s812_s0, %s812_s0 }
  0x40   :  { %p819_p2 = por %p818_p1, %p817_p0 }
  0x42   :  { %p820_p3 = pnand %p819_p2, %p813_p13 }
  0x44   :  { %823 = shalt.err (!%p820_p3)
}
  0x45   :  { %56 = dma.hbm_to_vmem [thread:$0]  %s1113_s3, 1024, %s51_s13, [#allocation6], %s901_s23, %s901_s23, %s902_s24  }
  0x46   :  { %s824_s27 = scalar_lea.hbm %s1117_s7, 1024 }
  0x47   :  { %p825_p4 = scmp.ne.s32.totalorder %s1117_s7, %s824_s27  ;;  %p828_p5 = scmp.lt.u32.totalorder %s824_s27, %s1117_s7 }
  0x49   :  { %p830_p6 = pnand %p828_p5, %p825_p4 }
  0x4b   :  { %833 = shalt.err (!%p830_p6)
}
  0x4c   :  { %s834_s12 = scalar_lea.vmem %s79_s16, 1024  ;;  %p839_p8 = scmp.lt.s32.totalorder %s79_s16, %s79_s16 }
  0x4d   :  { %p835_p7 = scmp.ne.s32.totalorder %s79_s16, %s834_s12  ;;  %p840_p9 = scmp.lt.s32.totalorder %s834_s12, %s834_s12 }
  0x4f   :  { %p841_p10 = por %p840_p9, %p839_p8 }
  0x51   :  { %p842_p11 = pnand %p841_p10, %p835_p7 }
  0x53   :  { %845 = shalt.err (!%p842_p11)
}
  0x54   :  { %84 = dma.hbm_to_vmem [thread:$0]  %s1117_s7, 1024, %s79_s16, [#allocation9], %s901_s23, %s901_s23, %s902_s24  }
  0x55   :  { %890 = dma.done.wait [#allocation3], 32  }
  0x56   :  { %891 = vsyncadd [#allocation3], 4294967264 }
  0x57   :  { %892 = dma.done.wait [#allocation6], 1536  }
  0x58   :  { %893 = vsyncadd [#allocation6], 4294965760 }
  0x59   :  { %894 = dma.done.wait [#allocation9], 2048  }
  0x5a   :  { %895 = vsyncadd [#allocation9], 4294965248  ;;  %v907_v0 = vmov 0.0   ;;  %vm908_vm0 = vmmov 0   ;;  %v708_v1 = vld [vmem:[#allocation5] sm:$0xff]   ;;  %v709_v2 = vld [vmem:[#allocation5 + $0x8] sm:$0xff]  }
  0x5b   :  { %625 = vmatprep.subr.bf16.mxu0 %v907_v0  ;;  %633 = vmatprep.mubr.msk.bf16.mxu0 %vm908_vm0, %v907_v0  ;;  %v712_v3 = vld [vmem:[#allocation7] sm:$0xff]   ;;  %v710_v4 = vld [vmem:[#allocation5 + $0x10] sm:$0xff]   ;;  %v713_v5 = vld [vmem:[#allocation7 + $0x8] sm:$0xff]   ;;  %vm144_vm1 = vcmask 523264  }
  0x5c   :  { %637 = vmatprep.subr.bf16.mxu1 %v907_v0  ;;  %653 = vmatprep.mubr.msk.bf16.mxu1 %vm908_vm0, %v907_v0  ;;  %v711_v6 = vld [vmem:[#allocation5 + $0x18] sm:$0xff]   ;;  %v714_v8 = vld [vmem:[#allocation7 + $0x10] sm:$0xff]   ;;  %v716_v11 = vld [vmem:[#allocation7 + $0x20] sm:$0xff]  }
  0x5d   :  { %626 = vmatpush3.bf16.msra.mxu0 %v708_v1  ;;  %638 = vmatpush3.bf16.msra.mxu1 %v712_v3  ;;  %v103_v7 = vld [vmem:[#allocation2] sm:$0x3]  ;;  %v717_v12 = vld [vmem:[#allocation7 + $0x28] sm:$0xff]   ;;  %v718_v13 = vld [vmem:[#allocation7 + $0x30] sm:$0xff]  }
  0x5e   :  { %627 = vmatprep.subr.bf16.mxu0 %v907_v0  ;;  %639 = vmatprep.subr.bf16.mxu1 %v907_v0  ;;  %v104_v9 = vpack.c.bf16 %v103_v7, %v103_v7  ;;  %v715_v10 = vld [vmem:[#allocation7 + $0x18] sm:$0xff]   ;;  %v720_v15 = vld [vmem:[#allocation8] sm:$0xff]   ;;  %v721_v16 = vld [vmem:[#allocation8 + $0x8] sm:$0xff]  }
  0x5f   :  { %v719_v14 = vld [vmem:[#allocation7 + $0x38] sm:$0xff]   ;;  %v722_v17 = vld [vmem:[#allocation8 + $0x10] sm:$0xff]   ;;  %v724_v19 = vld [vmem:[#allocation8 + $0x20] sm:$0xff]  }
  0x60   :  { %v723_v18 = vld [vmem:[#allocation8 + $0x18] sm:$0xff]   ;;  %v725_v20 = vld [vmem:[#allocation8 + $0x28] sm:$0xff]   ;;  %v726_v29 = vld [vmem:[#allocation8 + $0x30] sm:$0xff]  }
  0x61   :  { %628 = vmatpush3.bf16.msra.mxu0 %v709_v2  ;;  %640 = vmatpush3.bf16.msra.mxu1 %v713_v5  ;;  %v560_v21 = vld [vmem:[%s1112_s2] ss:$0 sm:$0xff]  ;;  %v728_v31 = vld [vmem:[#allocation10] sm:$0xff]   ;;  %v729_v32 = vld [vmem:[#allocation10 + $0x8] sm:$0xff]  }
  0x62   :  { %629 = vmatprep.subr.bf16.mxu0 %v907_v0  ;;  %641 = vmatprep.subr.bf16.mxu1 %v907_v0  ;;  %v727_v30 = vld [vmem:[#allocation8 + $0x38] sm:$0xff]   ;;  %v730_v33 = vld [vmem:[#allocation10 + $0x10] sm:$0xff]   ;;  %v732_v35 = vld [vmem:[#allocation10 + $0x20] sm:$0xff]  }
  0x63   :  { %v731_v34 = vld [vmem:[#allocation10 + $0x18] sm:$0xff]   ;;  %v733_v36 = vld [vmem:[#allocation10 + $0x28] sm:$0xff]   ;;  %v734_v45 = vld [vmem:[#allocation10 + $0x30] sm:$0xff]  }
  0x64   :  { %v566_v37 = vld [vmem:[%s1114_s4] ss:$0 sm:$0xff]  ;;  %s909_s4 = smov [#allocation12]  }
  0x65   :  { %630 = vmatpush3.bf16.msra.mxu0 %v710_v4  ;;  %642 = vmatpush3.bf16.msra.mxu1 %v714_v8  ;;  %v735_v46 = vld [vmem:[#allocation10 + $0x38] sm:$0xff]   ;;  %s545_s17 = sshll.u32 %s909_s4, 4  ;;  %s546_s17 = int_to_ptr.vmem [resolvable:$true] %s545_s17 }
  0x66   :  { %631 = vmatprep.subr.bf16.mxu0 %v907_v0  ;;  %643 = vmatprep.subr.bf16.mxu1 %v907_v0  ;;  %v575_v47 = vld [vmem:[%s1116_s6] ss:$0 sm:$0xff]  ;;  %s846_s18 = scalar_lea.vmem %s546_s17, 16  ;;  %s850_s1 = scalar_lea.vmem %s546_s17, 32 }
  0x67   :  { %p847_p12 = scmp.ne.s32.totalorder %s546_s17, %s846_s18  ;;  %p851_p13 = scmp.lt.s32.totalorder %s546_s17, %s546_s17 }
  0x68   :  { %p852_p0 = scmp.lt.s32.totalorder %s850_s1, %s846_s18 }
  0x69   :  { %632 = vmatpush3.bf16.msra.mxu0 %v711_v6  ;;  %644 = vmatpush3.bf16.msra.mxu1 %v715_v10 }
  0x6a   :  { %657 = vmatprep.subr.bf16.mxu0 %v907_v0  ;;  %645 = vmatprep.subr.bf16.mxu1 %v907_v0  ;;  %p853_p1 = por %p852_p0, %p851_p13 }
  0x6c   :  { %634 = vmatmul.mubr.msk.bf16.vlgmr.msra.gmra.mrb[0].mxu0 %vm144_vm1, %v104_v9  ;;  %p854_p2 = pnand %p853_p1, %p847_p12 }
  0x6d   :  { %673 = vmatprep.mubr.msk.bf16.mxu0 %vm908_vm0, %v907_v0  ;;  %646 = vmatpush3.bf16.msra.mxu1 %v716_v11 }
  0x6e   :  { %647 = vmatprep.subr.bf16.mxu1 %v907_v0  ;;  %658 = vmatpush3.bf16.msra.mxu0 %v720_v15 }
  0x6f   :  { %659 = vmatprep.subr.bf16.mxu0 %v907_v0 }
  0x71   :  { %648 = vmatpush3.bf16.msra.mxu1 %v717_v12 }
  0x72   :  { %649 = vmatprep.subr.bf16.mxu1 %v907_v0  ;;  %660 = vmatpush3.bf16.msra.mxu0 %v721_v16 }
  0x73   :  { %661 = vmatprep.subr.bf16.mxu0 %v907_v0 }
  0x75   :  { %650 = vmatpush3.bf16.msra.mxu1 %v718_v13 }
  0x76   :  { %651 = vmatprep.subr.bf16.mxu1 %v907_v0  ;;  %662 = vmatpush3.bf16.msra.mxu0 %v722_v17 }
  0x77   :  { %663 = vmatprep.subr.bf16.mxu0 %v907_v0 }
  0x79   :  { %652 = vmatpush3.bf16.msra.mxu1 %v719_v14 }
  0x7a   :  { %677 = vmatprep.subr.bf16.mxu1 %v907_v0  ;;  %664 = vmatpush3.bf16.msra.mxu0 %v723_v18 }
  0x7b   :  { %665 = vmatprep.subr.bf16.mxu0 %v907_v0 }
  0x7e   :  { %666 = vmatpush3.bf16.msra.mxu0 %v724_v19 }
  0x7f   :  { %667 = vmatprep.subr.bf16.mxu0 %v907_v0 }
  0x82   :  { %668 = vmatpush3.bf16.msra.mxu0 %v725_v20 }
  0x83   :  { %669 = vmatprep.subr.bf16.mxu0 %v907_v0 }
  0x86   :  { %670 = vmatpush3.bf16.msra.mxu0 %v726_v29 }
  0x87   :  { %671 = vmatprep.subr.bf16.mxu0 %v907_v0 }
  0x8a   :  { %672 = vmatpush3.bf16.msra.mxu0 %v727_v30 }
 0x13f   :  { %v182_v22 = vpop.f32.mrb[0].mxu0 }
 0x140   :  { %v183_v23 = vadd.f32 %v560_v21, %v182_v22  ;;  %v635_v24 = vpop.f32.mrb[1].mxu0 }
 0x141   :  { %v185_v25 = vpop.f32.mrb[2].mxu0 }
 0x142   :  { %v188_v26 = vmax.f32 %v183_v23, 0.0  ;;  %v636_v27 = vpop.f32.mrb[3].mxu0 }
 0x144   :  { %v189_v28 = vpack.c.bf16 %v188_v26, %v188_v26 }
 0x146   :  { %654 = vmatmul.mubr.bf16.vlgmr.msra.gmra.mrb[0].mxu1 %v189_v28 }
 0x147   :  { %693 = vmatprep.mubr.msk.bf16.mxu1 %vm908_vm0, %v907_v0  ;;  %678 = vmatpush3.bf16.msra.mxu1 %v728_v31 }
 0x148   :  { %679 = vmatprep.subr.bf16.mxu1 %v907_v0 }
 0x14b   :  { %680 = vmatpush3.bf16.msra.mxu1 %v729_v32 }
 0x14c   :  { %681 = vmatprep.subr.bf16.mxu1 %v907_v0 }
 0x14f   :  { %682 = vmatpush3.bf16.msra.mxu1 %v730_v33 }
 0x150   :  { %683 = vmatprep.subr.bf16.mxu1 %v907_v0 }
 0x153   :  { %684 = vmatpush3.bf16.msra.mxu1 %v731_v34 }
 0x154   :  { %685 = vmatprep.subr.bf16.mxu1 %v907_v0 }
 0x157   :  { %686 = vmatpush3.bf16.msra.mxu1 %v732_v35 }
 0x158   :  { %687 = vmatprep.subr.bf16.mxu1 %v907_v0 }
 0x15b   :  { %688 = vmatpush3.bf16.msra.mxu1 %v733_v36 }
 0x15c   :  { %689 = vmatprep.subr.bf16.mxu1 %v907_v0 }
 0x15f   :  { %690 = vmatpush3.bf16.msra.mxu1 %v734_v45 }
 0x160   :  { %691 = vmatprep.subr.bf16.mxu1 %v907_v0 }
 0x163   :  { %692 = vmatpush3.bf16.msra.mxu1 %v735_v46 }
 0x219   :  { %v295_v38 = vpop.f32.mrb[0].mxu1 }
 0x21a   :  { %v296_v39 = vadd.f32 %v566_v37, %v295_v38  ;;  %v655_v40 = vpop.f32.mrb[1].mxu1 }
 0x21b   :  { %v298_v41 = vpop.f32.mrb[2].mxu1 }
 0x21c   :  { %v301_v42 = vmax.f32 %v296_v39, 0.0  ;;  %v656_v43 = vpop.f32.mrb[3].mxu1 }
 0x21e   :  { %v302_v44 = vpack.c.bf16 %v301_v42, %v301_v42 }
 0x220   :  { %674 = vmatmul.mubr.bf16.vlgmr.msra.gmra.mrb[4].mxu0 %v302_v44 }
 0x2f3   :  { %v408_v48 = vpop.f32.mrb[4].mxu0 }
 0x2f4   :  { %v409_v49 = vadd.f32 %v575_v47, %v408_v48  ;;  %v675_v50 = vpop.f32.mrb[5].mxu0 }
 0x2f5   :  { %v411_v51 = vpop.f32.mrb[6].mxu0 }
 0x2f6   :  { %v414_v52 = vmax.f32 %v409_v49, 0.0  ;;  %v676_v53 = vpop.f32.mrb[7].mxu0 }
 0x2f8   :  { %v415_v54 = vpack.c.bf16 %v414_v52, %v414_v52 }
 0x2fa   :  { %416 = vst [vmem:[#allocation12] sm:$0x1] %v415_v54  ;;  %694 = vmatmul.mubr.bf16.vlgmr.msra.gmra.mrb[4].mxu1 %v415_v54 }
 0x2fb   :  { %857 = shalt.err (!%p854_p2)
}
 0x2fc   :  { %s858_s19 = scalar_lea.hbm %s1120_s10, 16 }
 0x2fd   :  { %p859_p3 = scmp.ne.s32.totalorder %s1120_s10, %s858_s19  ;;  %p862_p4 = scmp.lt.u32.totalorder %s858_s19, %s1120_s10 }
 0x2ff   :  { %p864_p5 = pnand %p862_p4, %p859_p3 }
 0x301   :  { %867 = shalt.err (!%p864_p5)
}
 0x302   :  { %548 = dma.vmem_to_hbm [thread:$0]  %s546_s17, 16, %s1120_s10, [#allocation13]   ;;  %v584_v55 = vld [vmem:[%s1118_s8] ss:$0 sm:$0xff] }
 0x303   :  { %s910_s29 = smov [#allocation11]  }
 0x304   :  { %s535_s11 = sshll.u32 %s910_s29, 4  ;;  %s536_s11 = int_to_ptr.vmem [resolvable:$true] %s535_s11 }
 0x305   :  { %s868_s5 = scalar_lea.vmem %s536_s11, 32  ;;  %p873_p7 = scmp.lt.s32.totalorder %s536_s11, %s536_s11 }
 0x306   :  { %p869_p6 = scmp.ne.s32.totalorder %s536_s11, %s868_s5  ;;  %p874_p8 = scmp.lt.s32.totalorder %s868_s5, %s868_s5 }
 0x308   :  { %p875_p9 = por %p874_p8, %p873_p7 }
 0x30a   :  { %p876_p10 = pnand %p875_p9, %p869_p6 }
 0x3cd   :  { %v522_v56 = vpop.f32.mrb[4].mxu1 }
 0x3ce   :  { %v523_v57 = vadd.f32 %v584_v55, %v522_v56  ;;  %v695_v58 = vpop.f32.mrb[5].mxu1 }
 0x3cf   :  { %v525_v59 = vpop.f32.mrb[6].mxu1 }
 0x3d0   :  { %528 = vst [vmem:[#allocation11] sm:$0x3] %v523_v57  ;;  %v696_v60 = vpop.f32.mrb[7].mxu1 }
 0x3d1   :  { %879 = shalt.err (!%p876_p10)
}
 0x3d2   :  { %s880_s8 = scalar_lea.hbm %s1119_s9, 32 }
 0x3d3   :  { %p881_p11 = scmp.ne.s32.totalorder %s1119_s9, %s880_s8  ;;  %p884_p12 = scmp.lt.u32.totalorder %s880_s8, %s1119_s9 }
 0x3d5   :  { %p886_p13 = pnand %p884_p12, %p881_p11 }
 0x3d7   :  { %889 = shalt.err (!%p886_p13)
}
 0x3d8   :  { %538 = dma.vmem_to_hbm [thread:$0]  %s536_s11, 32, %s1119_s9, [#allocation4]  }
 0x3d9   :  { %896 = dma.done.wait [#allocation4], 32  }
 0x3da   :  { %897 = vsyncadd [#allocation4], 4294967264 }
 0x3db   :  { %898 = dma.done.wait [#allocation13], 16  }
 0x3dc   :  { %899 = vsyncadd [#allocation13], 4294967280 }
 0x3dd   :  { %555 = vsyncpa [#allocation3], 1 }
 0x3de   :  { %556 = vsyncpa [#allocation6], 1 }
 0x3df   :  { %557 = vsyncpa [#allocation9], 1 }
 0x3e0   :  { %558 = vsyncpa [#allocation4], 1 }
 0x3e1   :  { %559 = vsyncpa [#allocation13], 1 }

</bundles_post_ra>
